<compile_context>
chip_gen: v7x
topology: tpu7x:2x2x1
jax: 0.10.0
libtpu: 0.0.40
codegen_flags: <defaults>
</compile_context>

<pallas_src>
import functools

import jax
import jax.numpy as jnp
from jax import lax
from jax.experimental import pallas as pl
from jax.experimental.pallas import tpu as pltpu


def _round_up(v, m):
    return ((v + m - 1) // m) * m


def _softplus(x, compute_dtype=jnp.float32):
    """torch.nn.Softplus(beta=1, threshold=20): x if x > 20 else log1p(exp(x)).

    The EUP part (exp/log1p) optionally runs in bf16 (v6e/v7x have a ~2x bf16
    EUP path); the comparison, the x>20 passthrough and the returned value stay
    in x's dtype (f32), and exp's argument is clamped so the untaken branch
    never overflows.
    """
    xe = jnp.minimum(x, 20.0)
    if jnp.dtype(compute_dtype) != x.dtype:
        xe = xe.astype(compute_dtype)
    sp = jnp.log1p(jnp.exp(xe)).astype(x.dtype)
    return jnp.where(x > 20.0, x, sp)


def _mlp_kernel(x_ref,
                w1_ref, b1_ref,
                w2_ref, b2_ref,
                w3_ref, b3_ref,
                w4t_ref, b4_ref,
                o_ref, *, softplus_dtype):
    w_dtype = w1_ref.dtype
    x = x_ref[...].astype(w_dtype)                          # (tn, x_in) batch-major

    # Layer 1 -- NT dot: the MXU contracts the feature dim of batch-major x
    # directly, producing (H, tn): batch on lanes, so every softplus below runs
    # on fully lane-dense vregs.
    h = jnp.einsum("of,nf->on", w1_ref[...], x,
                   preferred_element_type=jnp.float32)      # (H, tn)
    h = _softplus(h + b1_ref[...].astype(jnp.float32), softplus_dtype)

    # Layers 2-3 -- plain NN dots; activations stay (H, tn), f32 accumulate.
    h = jnp.dot(w2_ref[...], h.astype(w_dtype),
                preferred_element_type=jnp.float32)
    h = _softplus(h + b2_ref[...].astype(jnp.float32), softplus_dtype)

    h = jnp.dot(w3_ref[...], h.astype(w_dtype),
                preferred_element_type=jnp.float32)
    h = _softplus(h + b3_ref[...].astype(jnp.float32), softplus_dtype)

    # Layer 4 -- TN dot: h^T @ w4^T comes out directly as the batch-major
    # (tn, x_out) tile, so neither the kernel store nor the wrapper needs a
    # transpose / extra HBM pass.
    out = lax.dot_general(h.astype(w_dtype), w4t_ref[...],
                          dimension_numbers=(((0,), (0,)), ((), ())),
                          preferred_element_type=jnp.float32)   # (tn, x_out)
    out = out + b4_ref[...].astype(jnp.float32)                 # b4 is (1, x_out)
    o_ref[...] = out.astype(o_ref.dtype)


def model_latent_f(x, params, *, tile_n=8192, softplus_dtype=jnp.float32,
                   out_dtype=None):
    """Fused forward of ModelLatentF.

    x: (N, x_in) batch-major; returns (N, x_out) batch-major (same semantics as
    the PyTorch module).  params: PyTorch-layout weights (out, in), biases
    (out, 1) or (out,).
    softplus_dtype: jnp.float32 (safe everywhere, default) or jnp.bfloat16
      (recommended on v6e/v7x: kernel is EUP-bound; validate with ~1e-2 tol).
    out_dtype: output dtype (default x.dtype); bf16 trims writeback bytes if
      the downstream statistic tolerates it.
    """
    N, x_in = x.shape
    H = params["w1"].shape[0]
    x_out = params["w4"].shape[0]
    out_dtype = x.dtype if out_dtype is None else jnp.dtype(out_dtype)

    # Tiny parameter reshuffles (a few KB total, done once by XLA outside the
    # kernel -- not a per-batch HBM pass).
    w1, w2, w3 = params["w1"], params["w2"], params["w3"]
    w4t = params["w4"].T                                   # (H, x_out) for TN dot
    b1 = params["b1"].reshape(H, 1)
    b2 = params["b2"].reshape(H, 1)
    b3 = params["b3"].reshape(H, 1)
    b4 = params["b4"].reshape(1, x_out)

    # ---- batch tile --------------------------------------------------------
    # Big tiles amortize the ~0.35us/grid-step overhead (VMEM is nowhere near a
    # constraint at these feature sizes), but keep >= 2 grid steps when N
    # allows so dimension_semantics=("parallel",) can use both v7x TensorCores
    # (cost on single-TC v5e/v6e is one extra tiny step -- negligible).
    tile_n = max(128, (int(tile_n) // 128) * 128)
    tile_n = min(tile_n, max(128, _round_up(pl.cdiv(N, 2), 128)))
    n_tiles = pl.cdiv(N, tile_n)
    n_pad = n_tiles * tile_n

    full = lambda shape: pl.BlockSpec(shape, lambda i: (0,) * len(shape))

    grid_spec = pltpu.PrefetchScalarGridSpec(
        num_scalar_prefetch=0,
        grid=(n_tiles,),
        in_specs=[
            # x streams batch-major; ragged final block is masked by Pallas.
            # (On v5e at very large tile_n, pipeline_mode=pl.Buffered(3) here
            #  is cheap insurance if the x DMA ever shows up exposed.)
            pl.BlockSpec((tile_n, x_in), lambda i: (i, 0)),
            full((H, x_in)),  full((H, 1)),            # layer 1 (resident)
            full((H, H)),     full((H, 1)),            # layer 2 (resident)
            full((H, H)),     full((H, 1)),            # layer 3 (resident)
            full((H, x_out)), full((1, x_out)),        # layer 4 (resident)
        ],
        out_specs=pl.BlockSpec((tile_n, x_out), lambda i: (i, 0)),
    )

    # Scoped-VMEM limit: generous estimate so large tiles also compile on v5e
    # (16 MiB default scoped VMEM); capped well under v7x's 64 MiB physical.
    f32 = 4
    vmem_est = f32 * tile_n * (2 * x_in + 2 * x_out + 4 * H)
    vmem_est += f32 * (x_in * H + 2 * H * H + H * x_out + 3 * H + x_out)
    vmem_limit = int(min(max(2 * vmem_est, 32 * 1024 * 1024), 56 * 1024 * 1024))

    # Advisory cost hint so XLA schedules around this EUP/HBM-bound call.
    p_item = jnp.dtype(w1.dtype).itemsize
    flops = 2 * n_pad * (x_in * H + 2 * H * H + H * x_out)
    transcendentals = 2 * 3 * n_pad * H                 # exp + log1p, 3 layers
    bytes_accessed = (x.dtype.itemsize * N * x_in
                      + jnp.dtype(out_dtype).itemsize * N * x_out
                      + p_item * (x_in * H + 2 * H * H + H * x_out)
                      + 4 * (3 * H + x_out))

    kernel = functools.partial(_mlp_kernel, softplus_dtype=softplus_dtype)
    return pl.pallas_call(
        kernel,
        out_shape=jax.ShapeDtypeStruct((N, x_out), out_dtype),
        grid_spec=grid_spec,
        compiler_params=pltpu.CompilerParams(
            dimension_semantics=("parallel",),
            vmem_limit_bytes=vmem_limit),
        cost_estimate=pl.CostEstimate(
            flops=int(flops),
            transcendentals=int(transcendentals),
            bytes_accessed=int(bytes_accessed)),
    )(x, w1, b1, w2, b2, w3, b3, w4t, b4)


def init_params(key, x_in, H, x_out):
    """Deterministic init mimicking torch.nn.Linear's U(-1/sqrt(fan_in), ...).

    Weights stored PyTorch-style as (out_features, in_features); biases (out, 1)."""
    def linear(k, fan_in, fan_out):
        kw, kb = jax.random.split(k)
        bound = 1.0 / jnp.sqrt(jnp.float32(fan_in))
        w = jax.random.uniform(kw, (fan_out, fan_in), jnp.float32, -bound, bound)
        b = jax.random.uniform(kb, (fan_out, 1), jnp.float32, -bound, bound)
        return w, b

    k1, k2, k3, k4 = jax.random.split(key, 4)
    w1, b1 = linear(k1, x_in, H)
    w2, b2 = linear(k2, H, H)
    w3, b3 = linear(k3, H, H)
    w4, b4 = linear(k4, H, x_out)
    return dict(w1=w1, b1=b1, w2=w2, b2=b2, w3=w3, b3=b3, w4=w4, b4=b4)


def _reference(x, p):
    """Pure-JAX reference (standard batch-major layout) for correctness check."""
    h = _softplus(x @ p["w1"].T + p["b1"].T)
    h = _softplus(h @ p["w2"].T + p["b2"].T)
    h = _softplus(h @ p["w3"].T + p["b3"].T)
    return h @ p["w4"].T + p["b4"].T


if __name__ == "__main__":
    # Small shapes consistent with ModelLatentF(x_in=16, H=32, x_out=16).
    # N=200 is deliberately NOT a multiple of the tile, exercising the masked
    # ragged final block; the tile cap keeps the grid at 2 parallel steps.
    N, x_in, H, x_out = 200, 16, 32, 16

    key = jax.random.PRNGKey(0)
    kx, kp = jax.random.split(key)
    x = jax.random.normal(kx, (N, x_in), jnp.float32)
    params = init_params(kp, x_in, H, x_out)

    ref = _reference(x, params)

    # Default f32 softplus path: tight tolerance.
    out = jax.block_until_ready(model_latent_f(x, params))
    assert out.shape == (N, x_out)
    assert jnp.allclose(out, ref, atol=1e-4, rtol=1e-4), "f32 mismatch vs reference"

    # bf16 EUP softplus knob (v6e/v7x perf path): looser tolerance by design.
    out_bf = jax.block_until_ready(
        model_latent_f(x, params, softplus_dtype=jnp.bfloat16))
    assert out_bf.shape == (N, x_out)
    assert jnp.allclose(out_bf, ref, atol=5e-2, rtol=5e-2), "bf16 mismatch vs reference"

    print("KERNEL_OK")
</pallas_src>

<mosaic_0001>
module attributes {stable_mosaic.version = 11 : i64} {
  func.func @_mlp_kernel(%arg0: i32, %arg1: memref<128x16xf32, #tpu.memory_space<vmem>>, %arg2: memref<32x16xf32, #tpu.memory_space<vmem>>, %arg3: memref<32x1xf32, #tpu.memory_space<vmem>>, %arg4: memref<32x32xf32, #tpu.memory_space<vmem>>, %arg5: memref<32x1xf32, #tpu.memory_space<vmem>>, %arg6: memref<32x32xf32, #tpu.memory_space<vmem>>, %arg7: memref<32x1xf32, #tpu.memory_space<vmem>>, %arg8: memref<32x16xf32, #tpu.memory_space<vmem>>, %arg9: memref<1x16xf32, #tpu.memory_space<vmem>>, %arg10: memref<128x16xf32, #tpu.memory_space<vmem>>) attributes {dimension_semantics = [#tpu.dimension_semantics<parallel>], iteration_bounds = array<i64: 2>, scalar_prefetch = 0 : i64, scratch_operands = 0 : i64, tpu.core_type = #tpu.core_type<tc>, window_params = [{transform_indices = @transform_0, window_bounds = array<i64: 128, 16>}, {pipeline_mode = #tpu.pipeline_mode<synchronous>, transform_indices = @transform_1, window_bounds = array<i64: 32, 16>}, {pipeline_mode = #tpu.pipeline_mode<synchronous>, transform_indices = @transform_2, window_bounds = array<i64: 32, 1>}, {pipeline_mode = #tpu.pipeline_mode<synchronous>, transform_indices = @transform_3, window_bounds = array<i64: 32, 32>}, {pipeline_mode = #tpu.pipeline_mode<synchronous>, transform_indices = @transform_4, window_bounds = array<i64: 32, 1>}, {pipeline_mode = #tpu.pipeline_mode<synchronous>, transform_indices = @transform_5, window_bounds = array<i64: 32, 32>}, {pipeline_mode = #tpu.pipeline_mode<synchronous>, transform_indices = @transform_6, window_bounds = array<i64: 32, 1>}, {pipeline_mode = #tpu.pipeline_mode<synchronous>, transform_indices = @transform_7, window_bounds = array<i64: 32, 16>}, {pipeline_mode = #tpu.pipeline_mode<synchronous>, transform_indices = @transform_8, window_bounds = array<i64: 1, 16>}, {transform_indices = @transform_9, window_bounds = array<i64: 128, 16>}]} {
    %c0 = arith.constant 0 : index
    %c0_0 = arith.constant 0 : index
    %0 = vector.load %arg1[%c0, %c0_0] : memref<128x16xf32, #tpu.memory_space<vmem>>, vector<128x16xf32>
    %c0_1 = arith.constant 0 : index
    %c0_2 = arith.constant 0 : index
    %1 = vector.load %arg2[%c0_1, %c0_2] : memref<32x16xf32, #tpu.memory_space<vmem>>, vector<32x16xf32>
    "tpu.trace_start"() <{level = 10 : i32, message = "of,nf->on"}> : () -> ()
    %cst = arith.constant dense<0.000000e+00> : vector<32x128xf32>
    %2 = tpu.matmul %1, %0, %cst {dimension_numbers = #tpu.dot_dimension_numbers<[1], [1], [0], [0], [0, 0, 1, 0], [], []>} : vector<32x16xf32>, vector<128x16xf32>, vector<32x128xf32> -> vector<32x128xf32>
    "tpu.trace_stop"() : () -> ()
    %c0_3 = arith.constant 0 : index
    %c0_4 = arith.constant 0 : index
    %3 = vector.load %arg3[%c0_3, %c0_4] : memref<32x1xf32, #tpu.memory_space<vmem>>, vector<32x1xf32>
    %4 = vector.broadcast %3 : vector<32x1xf32> to vector<32x128xf32>
    %5 = arith.addf %2, %4 : vector<32x128xf32>
    %cst_5 = arith.constant 2.000000e+01 : f32
    %6 = vector.broadcast %cst_5 : f32 to vector<32x128xf32>
    %7 = arith.minimumf %5, %6 : vector<32x128xf32>
    %8 = math.exp %7 : vector<32x128xf32>
    %9 = math.log1p %8 : vector<32x128xf32>
    %cst_6 = arith.constant 2.000000e+01 : f32
    %10 = vector.broadcast %cst_6 : f32 to vector<32x128xf32>
    %11 = arith.cmpf ogt, %5, %10 : vector<32x128xf32>
    %12 = arith.select %11, %5, %9 : vector<32x128xi1>, vector<32x128xf32>
    %c0_7 = arith.constant 0 : index
    %c0_8 = arith.constant 0 : index
    %13 = vector.load %arg4[%c0_7, %c0_8] : memref<32x32xf32, #tpu.memory_space<vmem>>, vector<32x32xf32>
    %cst_9 = arith.constant dense<0.000000e+00> : vector<32x128xf32>
    %14 = tpu.matmul %13, %12, %cst_9 {dimension_numbers = #tpu.dot_dimension_numbers<[1], [0], [0], [1], [0, 0, 1, 1], [], []>} : vector<32x32xf32>, vector<32x128xf32>, vector<32x128xf32> -> vector<32x128xf32>
    %c0_10 = arith.constant 0 : index
    %c0_11 = arith.constant 0 : index
    %15 = vector.load %arg5[%c0_10, %c0_11] : memref<32x1xf32, #tpu.memory_space<vmem>>, vector<32x1xf32>
    %16 = vector.broadcast %15 : vector<32x1xf32> to vector<32x128xf32>
    %17 = arith.addf %14, %16 : vector<32x128xf32>
    %cst_12 = arith.constant 2.000000e+01 : f32
    %18 = vector.broadcast %cst_12 : f32 to vector<32x128xf32>
    %19 = arith.minimumf %17, %18 : vector<32x128xf32>
    %20 = math.exp %19 : vector<32x128xf32>
    %21 = math.log1p %20 : vector<32x128xf32>
    %cst_13 = arith.constant 2.000000e+01 : f32
    %22 = vector.broadcast %cst_13 : f32 to vector<32x128xf32>
    %23 = arith.cmpf ogt, %17, %22 : vector<32x128xf32>
    %24 = arith.select %23, %17, %21 : vector<32x128xi1>, vector<32x128xf32>
    %c0_14 = arith.constant 0 : index
    %c0_15 = arith.constant 0 : index
    %25 = vector.load %arg6[%c0_14, %c0_15] : memref<32x32xf32, #tpu.memory_space<vmem>>, vector<32x32xf32>
    %cst_16 = arith.constant dense<0.000000e+00> : vector<32x128xf32>
    %26 = tpu.matmul %25, %24, %cst_16 {dimension_numbers = #tpu.dot_dimension_numbers<[1], [0], [0], [1], [0, 0, 1, 1], [], []>} : vector<32x32xf32>, vector<32x128xf32>, vector<32x128xf32> -> vector<32x128xf32>
    %c0_17 = arith.constant 0 : index
    %c0_18 = arith.constant 0 : index
    %27 = vector.load %arg7[%c0_17, %c0_18] : memref<32x1xf32, #tpu.memory_space<vmem>>, vector<32x1xf32>
    %28 = vector.broadcast %27 : vector<32x1xf32> to vector<32x128xf32>
    %29 = arith.addf %26, %28 : vector<32x128xf32>
    %cst_19 = arith.constant 2.000000e+01 : f32
    %30 = vector.broadcast %cst_19 : f32 to vector<32x128xf32>
    %31 = arith.minimumf %29, %30 : vector<32x128xf32>
    %32 = math.exp %31 : vector<32x128xf32>
    %33 = math.log1p %32 : vector<32x128xf32>
    %cst_20 = arith.constant 2.000000e+01 : f32
    %34 = vector.broadcast %cst_20 : f32 to vector<32x128xf32>
    %35 = arith.cmpf ogt, %29, %34 : vector<32x128xf32>
    %36 = arith.select %35, %29, %33 : vector<32x128xi1>, vector<32x128xf32>
    %c0_21 = arith.constant 0 : index
    %c0_22 = arith.constant 0 : index
    %37 = vector.load %arg8[%c0_21, %c0_22] : memref<32x16xf32, #tpu.memory_space<vmem>>, vector<32x16xf32>
    %cst_23 = arith.constant dense<0.000000e+00> : vector<128x16xf32>
    %38 = tpu.matmul %36, %37, %cst_23 {dimension_numbers = #tpu.dot_dimension_numbers<[0], [0], [1], [1], [0, 1, 1, 1], [], []>} : vector<32x128xf32>, vector<32x16xf32>, vector<128x16xf32> -> vector<128x16xf32>
    %c0_24 = arith.constant 0 : index
    %c0_25 = arith.constant 0 : index
    %39 = vector.load %arg9[%c0_24, %c0_25] : memref<1x16xf32, #tpu.memory_space<vmem>>, vector<1x16xf32>
    %40 = vector.broadcast %39 : vector<1x16xf32> to vector<128x16xf32>
    %41 = arith.addf %38, %40 : vector<128x16xf32>
    %c0_26 = arith.constant 0 : index
    %c0_27 = arith.constant 0 : index
    %42 = vector.load %arg10[%c0_26, %c0_27] : memref<128x16xf32, #tpu.memory_space<vmem>>, vector<128x16xf32>
    tpu.vector_store %arg10[%c0_26, %c0_27], %41 {strides = array<i32>} : memref<128x16xf32, #tpu.memory_space<vmem>>, vector<128x16xf32>,
    return
  }
  func.func @transform_0(%arg0: i32) -> (i32, i32) {
    %c0_i32 = arith.constant 0 : i32
    %c0_i32_0 = arith.constant 0 : i32
    return %arg0, %c0_i32 : i32, i32
  }
  func.func @transform_1(%arg0: i32) -> (i32, i32) {
    %c0_i32 = arith.constant 0 : i32
    %c0_i32_0 = arith.constant 0 : i32
    %c0_i32_1 = arith.constant 0 : i32
    return %c0_i32, %c0_i32_0 : i32, i32
  }
  func.func @transform_2(%arg0: i32) -> (i32, i32) {
    %c0_i32 = arith.constant 0 : i32
    %c0_i32_0 = arith.constant 0 : i32
    %c0_i32_1 = arith.constant 0 : i32
    return %c0_i32, %c0_i32_0 : i32, i32
  }
  func.func @transform_3(%arg0: i32) -> (i32, i32) {
    %c0_i32 = arith.constant 0 : i32
    %c0_i32_0 = arith.constant 0 : i32
    %c0_i32_1 = arith.constant 0 : i32
    return %c0_i32, %c0_i32_0 : i32, i32
  }
  func.func @transform_4(%arg0: i32) -> (i32, i32) {
    %c0_i32 = arith.constant 0 : i32
    %c0_i32_0 = arith.constant 0 : i32
    %c0_i32_1 = arith.constant 0 : i32
    return %c0_i32, %c0_i32_0 : i32, i32
  }
  func.func @transform_5(%arg0: i32) -> (i32, i32) {
    %c0_i32 = arith.constant 0 : i32
    %c0_i32_0 = arith.constant 0 : i32
    %c0_i32_1 = arith.constant 0 : i32
    return %c0_i32, %c0_i32_0 : i32, i32
  }
  func.func @transform_6(%arg0: i32) -> (i32, i32) {
    %c0_i32 = arith.constant 0 : i32
    %c0_i32_0 = arith.constant 0 : i32
    %c0_i32_1 = arith.constant 0 : i32
    return %c0_i32, %c0_i32_0 : i32, i32
  }
  func.func @transform_7(%arg0: i32) -> (i32, i32) {
    %c0_i32 = arith.constant 0 : i32
    %c0_i32_0 = arith.constant 0 : i32
    %c0_i32_1 = arith.constant 0 : i32
    return %c0_i32, %c0_i32_0 : i32, i32
  }
  func.func @transform_8(%arg0: i32) -> (i32, i32) {
    %c0_i32 = arith.constant 0 : i32
    %c0_i32_0 = arith.constant 0 : i32
    %c0_i32_1 = arith.constant 0 : i32
    return %c0_i32, %c0_i32_0 : i32, i32
  }
  func.func @transform_9(%arg0: i32) -> (i32, i32) {
    %c0_i32 = arith.constant 0 : i32
    %c0_i32_0 = arith.constant 0 : i32
    return %arg0, %c0_i32 : i32, i32
  }
}

</mosaic_0001>

<bundles_post_ra>
// kernel: tpu_custom_call.1
= control target key start
LH: loop header
LB: loop body
LE: loop exit
PB: predicated region body
PF: predicated region fallthrough
CT: control target
= control target key end

     0   :  { %s2067_s30 = smov 0   ;;  %s2069_s10 = smov 0   ;;  %s2445_s0 = inlined_call_operand.vmem [shape: f32[200,16], index: 0, kind: input, shape index: {}]   ;;  %s2446_s1 = inlined_call_operand.vmem [shape: f32[32,16], index: 1, kind: input, shape index: {}]   ;;  %s2447_s2 = inlined_call_operand.vmem [shape: f32[32,1], index: 2, kind: input, shape index: {}]   ;;  %s2448_s3 = inlined_call_operand.vmem [shape: f32[32,32], index: 3, kind: input, shape index: {}]   ;;  %s2449_s4 = inlined_call_operand.vmem [shape: f32[32,1], index: 4, kind: input, shape index: {}]   ;;  %s2450_s5 = inlined_call_operand.vmem [shape: f32[32,32], index: 5, kind: input, shape index: {}]   ;;  %s2451_s6 = inlined_call_operand.vmem [shape: f32[32,1], index: 6, kind: input, shape index: {}]   ;;  %s2452_s7 = inlined_call_operand.vmem [shape: f32[32,16], index: 7, kind: input, shape index: {}]   ;;  %s2453_s8 = inlined_call_operand.vmem [shape: f32[1,16], index: 8, kind: input, shape index: {}]   ;;  %s2454_s9 = inlined_call_operand.vmem [shape: f32[200,16], index: 9, kind: output, shape index: {}]  }
   0x1   :  { %s2071_s11 = smov 0  }
   0x2 LB: > { %s2080_s12 = sadd.s32 4294967295, %s1982_s11   ;;  %s2082_s13 = sadd.s32 1, %s1982_s11   ;;  %s1982_s11 = sphi %s2071_s11, %s2463_s11   ;;  %s1978_s10 = sphi %s2069_s10, %s2462_s10   ;;  %s1974_s30 = sphi %s2067_s30, %s2461_s30  }
   0x3   : > { %s217_s14 = ssub.s32 %s1982_s11, %s2082_s13  ;;  %s220_s15 = sadd.s32 1, %s1978_s10 }
   0x4   : > { %p218_p0 = scmp.eq.s32.totalorder %s217_s14, 0  ;;  %p230_p1 = scmp.ne.s32.totalorder %s1978_s10, %s1974_s30 }
   0x5   : > { %p231_p2 = scmp.eq.s32.totalorder %s2080_s12, 1  ;;  %p1493_p3 = scmp.ge.s32.totalorder %s1982_s11, 1 }
   0x6   : > { %s2090_s16 = scalar_select %p218_p0, %s1978_s10, %s220_s15  }
   0x7   : > { %p2092_p4 = por %p231_p2, %p230_p1  ;;  %p296_p5 = scmp.lt.s32.totalorder %s1982_s11, 3 }
   0x9   : > { %p297_p6 = pnand %p1493_p3, %p296_p5 }
   0xa   : > { %s2097_s18 = sshll.u32 (!%p297_p6), %s2080_s12, 4  ;;  %vm398_vm0 = vcmask (!%p297_p6), 130048   ;;  %v370_v0 = vld [vmem:[%s2446_s1] sm:$0xff] (!%p297_p6)  ;;  %v2016_v1 = vmov (!%p297_p6), 0   ;;  %v376_v3 = vld [vmem:[%s2447_s2 + $0x10] sm:$0xff] (!%p297_p6)  ;;  %v375_v4 = vld [vmem:[%s2447_s2 + $0x8] sm:$0xff] (!%p297_p6) }
   0xb   : > { %300 = sbr.rel (%p297_p6) target bundleno = 1304 (0x518), region = 56  ;;  %p340_p7 = scmp.lt.s32.totalorder (!%p297_p6), %s2097_s18, 24  ;;  %1650 = vmatprep.mubr.msk.f32.mxu0 (!%p297_p6), %vm398_vm0, %v370_v0  ;;  %1878 = vset.pattern.permute.xlu0 (!%p297_p6), %v2016_v1  ;;  %v374_v2 = vld [vmem:[%s2447_s2] sm:$0xff] (!%p297_p6)  ;;  %v377_v5 = vld [vmem:[%s2447_s2 + $0x18] sm:$0xff] (!%p297_p6)  ;;  %vm2124_vm1 = vmpackc.low (!%p297_p6), %vm398_vm0, %vm398_vm0  ;;  %vm628_vm2 = vcmask (!%p297_p6), 261120  }
   0xc   : > { %380 = vperm.xlu0 (!%p297_p6), %1878, %v374_v2   ;;  %1879 = vset.pattern.permute.xlu1 (!%p297_p6), %v2016_v1  ;;  %v604_v7 = vld [vmem:[%s2449_s4] sm:$0xff] (!%p297_p6)  ;;  %v605_v13 = vld [vmem:[%s2449_s4 + $0x8] sm:$0xff] (!%p297_p6)  ;;  %v606_v15 = vld [vmem:[%s2449_s4 + $0x10] sm:$0xff] (!%p297_p6) }
   0xd   : > { %390 = vperm.xlu1 (!%p297_p6), %1879, %v376_v3   ;;  %v607_v16 = vld [vmem:[%s2449_s4 + $0x18] sm:$0xff] (!%p297_p6)  ;;  %v786_v19 = vld [vmem:[%s2451_s6] sm:$0xff] (!%p297_p6)  ;;  %v787_v21 = vld [vmem:[%s2451_s6 + $0x8] sm:$0xff] (!%p297_p6) }
   0xe   : > { %v788_v22 = vld [vmem:[%s2451_s6 + $0x10] sm:$0xff] (!%p297_p6)  ;;  %v789_v23 = vld [vmem:[%s2451_s6 + $0x18] sm:$0xff] (!%p297_p6)  ;;  %v371_v39 = vld [vmem:[%s2446_s1 + $0x8] sm:$0xff] (!%p297_p6) }
   0xf   : > { %v372_v40 = vld [vmem:[%s2446_s1 + $0x10] sm:$0xff] (!%p297_p6)  ;;  %v373_v41 = vld [vmem:[%s2446_s1 + $0x18] sm:$0xff] (!%p297_p6)  ;;  %v600_v42 = vld [vmem:[%s2448_s3] sm:$0xff] (!%p297_p6) }
  0x10   : > { %385 = vperm.xlu0 (!%p297_p6), %1878, %v375_v4   ;;  %1664 = vmatprep.mubr.msk.f32.mxu1 (!%p297_p6), %vm628_vm2, %v600_v42  ;;  %v602_v42 = vld [vmem:[%s2448_s3 + $0x10] sm:$0xff] (!%p297_p6) }
  0x11   : > { %395 = vperm.xlu1 (!%p297_p6), %1879, %v377_v5  }
  0x12   : > { %s341_s25 = scalar_select %p340_p7, %s2097_s18, 24 }
  0x13   : > { %s1559_s29 = sshll.u32 (%p2092_p4), %s2080_s12, 7 }
  0x14   : > { %s1496_s11 = sshll.u32 %s341_s25, 3  ;;  %610 = vperm.xlu0 %1878, %v604_v7   ;;  %s332_s25 = sand.u32 1, %s1974_s30  }
  0x15   : > { %s2120_s19 = scalar_lea.vmem %s2445_s0, %s1496_s11  ;;  %615 = vperm.xlu1 %1879, %v605_v13   ;;  %s1494_s26 = sshll.u32 %s332_s25, 7 }
  0x16   : > { %v354_v8 = vld [vmem:[%s2120_s19] sm:$0xff]  ;;  %v355_v9 = vld [vmem:[%s2120_s19 + $0x8] sm:$0xff]  ;;  %v356_v10 = vld [vmem:[%s2120_s19 + $0x10] sm:$0xff]  ;;  %s2311_s28 = scalar_lea.vmem [#allocation2], %s1494_s26   ;;  %s1223_s30 = ssub.s32 (%p2092_p4), 25, %s2097_s18 }
  0x17   : > { %v1716_v11 = vpack.c.bf16 %v355_v9, %v354_v8  ;;  %v357_v12 = vld [vmem:[%s2120_s19 + $0x18] sm:$0xff]  ;;  %v358_v17 = vld [vmem:[%s2120_s19 + $0x20] sm:$0xff]  ;;  %v359_v18 = vld [vmem:[%s2120_s19 + $0x28] sm:$0xff]  ;;  %p1224_p8 = scmp.lt.s32.totalorder (%p2092_p4), %s1223_s30, 16  ;;  %s2352_s15 = scalar_lea.vmem (%p2092_p4), %s2454_s9, %s1559_s29  }
  0x18   : > { %v1722_v14 = vpack.c.bf16 %v357_v12, %v356_v10  ;;  %620 = vperm.xlu0 %1878, %v606_v15   ;;  %v1728_v20 = vpack.c.bf16 %v359_v18, %v358_v17  ;;  %v360_v24 = vld [vmem:[%s2120_s19 + $0x30] sm:$0xff]  ;;  %v361_v25 = vld [vmem:[%s2120_s19 + $0x38] sm:$0xff]  ;;  %v362_v27 = vld [vmem:[%s2120_s19 + $0x40] sm:$0xff] }
  0x19   : > { %1718 = vmatprep.subr.msk.bf16.mxu0 %vm2124_vm1, %v1716_v11  ;;  %625 = vperm.xlu1 %1879, %v607_v16   ;;  %v1734_v26 = vpack.c.bf16 %v361_v25, %v360_v24  ;;  %v363_v28 = vld [vmem:[%s2120_s19 + $0x48] sm:$0xff]  ;;  %v364_v30 = vld [vmem:[%s2120_s19 + $0x50] sm:$0xff]  ;;  %v365_v31 = vld [vmem:[%s2120_s19 + $0x58] sm:$0xff] }
  0x1a   : > { %1721 = vmatpush3.bf16.xpose.msk.msra.mxu0 %vm2124_vm1, %v1716_v11  ;;  %v1740_v29 = vpack.c.bf16 %v363_v28, %v362_v27  ;;  %v1746_v32 = vpack.c.bf16 %v365_v31, %v364_v30  ;;  %v366_v33 = vld [vmem:[%s2120_s19 + $0x60] sm:$0xff]  ;;  %v367_v34 = vld [vmem:[%s2120_s19 + $0x68] sm:$0xff]  ;;  %v368_v36 = vld [vmem:[%s2120_s19 + $0x70] sm:$0xff] }
  0x1b   : > { %1724 = vmatprep.subr.msk.bf16.mxu0 %vm2124_vm1, %v1722_v14  ;;  %v1752_v35 = vpack.c.bf16 %v367_v34, %v366_v33  ;;  %v369_v37 = vld [vmem:[%s2120_s19 + $0x78] sm:$0xff] }
  0x1c   : > { %792 = vperm.xlu0 %1878, %v786_v19   ;;  %v1758_v38 = vpack.c.bf16 %v369_v37, %v368_v36 }
  0x1d   : > { %797 = vperm.xlu1 %1879, %v787_v21  }
  0x20   : > { %802 = vperm.xlu0 %1878, %v788_v22  }
  0x21   : > { %807 = vperm.xlu1 %1879, %v789_v23  }
  0x22   : > { %1727 = vmatpush3.bf16.xpose.msk.msra.mxu0 %vm2124_vm1, %v1722_v14 }
  0x23   : > { %1730 = vmatprep.subr.msk.bf16.mxu0 %vm2124_vm1, %v1728_v20 }
  0x2a   : > { %1733 = vmatpush3.bf16.xpose.msk.msra.mxu0 %vm2124_vm1, %v1728_v20 }
  0x2b   : > { %1736 = vmatprep.subr.msk.bf16.mxu0 %vm2124_vm1, %v1734_v26 }
  0x32   : > { %1739 = vmatpush3.bf16.xpose.msk.msra.mxu0 %vm2124_vm1, %v1734_v26 }
  0x33   : > { %1742 = vmatprep.subr.msk.bf16.mxu0 %vm2124_vm1, %v1740_v29 }
  0x3a   : > { %1745 = vmatpush3.bf16.xpose.msk.msra.mxu0 %vm2124_vm1, %v1740_v29 }
  0x3b   : > { %1748 = vmatprep.subr.msk.bf16.mxu0 %vm2124_vm1, %v1746_v32 }
  0x42   : > { %1751 = vmatpush3.bf16.xpose.msk.msra.mxu0 %vm2124_vm1, %v1746_v32 }
  0x43   : > { %1754 = vmatprep.subr.msk.bf16.mxu0 %vm2124_vm1, %v1752_v35 }
  0x4a   : > { %1757 = vmatpush3.bf16.xpose.msk.msra.mxu0 %vm2124_vm1, %v1752_v35 }
  0x4b   : > { %1760 = vmatprep.subr.msk.bf16.mxu0 %vm2124_vm1, %v1758_v38 }
  0x52   : > { %1763 = vmatpush3.bf16.xpose.msk.msra.mxu0 %vm2124_vm1, %v1758_v38 }
  0x59   : > { %1651 = vmatmul.mubr.msk.f32.vlgmr.msra.gmra.mrb[0].mxu0 %vm398_vm0, %v371_v39 }
  0x5a   : > { %1653 = vmatprep.mubr.msk.f32.mxu0 %vm398_vm0, %v372_v40 }
  0x5d   : > { %1654 = vmatmul.mubr.msk.f32.gmra.mrb[2].mxu0 %vm398_vm0, %v373_v41  ;;  %v601_v41 = vld [vmem:[%s2448_s3 + $0x8] sm:$0xff] }
  0x8b   : > { %v381_v43 = vpop.permute.xlu0 %380 }
  0x8c   : > { %v391_v44 = vpop.permute.xlu1 %390 }
  0x8f   : > { %v386_v45 = vpop.permute.xlu0 %385 }
  0x90   : > { %v396_v51 = vpop.permute.xlu1 %395 }
 0x12c   : > { %v1652_v46 = vpop.f32.mrb[0].mxu0 }
 0x12d   : > { %v531_v47 = vadd.f32 %v1652_v46, %v386_v45  ;;  %v525_v48 = vpop.f32.mrb[1].mxu0  ;;  %v616_v45 = vpop.permute.xlu1 %615 }
 0x12e   : > { %v526_v49 = vadd.f32 %v525_v48, %v381_v43  ;;  %v603_v43 = vld [vmem:[%s2448_s3 + $0x18] sm:$0xff]  ;;  %v611_v46 = vpop.permute.xlu0 %610 }
 0x12f   : > { %v545_v50 = vmin.f32 %v531_v47, 20.0  ;;  %vm593_vm5 = vcmp.gt.f32.partialorder %v531_v47, 20.0 }
 0x130   : > { %v544_v52 = vmin.f32 %v526_v49, 20.0  ;;  %v1655_v53 = vpop.f32.mrb[2].mxu0  ;;  %vm592_vm6 = vcmp.gt.f32.partialorder %v526_v49, 20.0 }
 0x131   : > { %v550_v54 = vmul.f32 1.442695, %v545_v50  ;;  %v2216_v55 = vadd.f32 %v1655_v53, %v396_v51  ;;  %v535_v56 = vpop.f32.mrb[3].mxu0 }
 0x132   : > { %v548_v57 = vmul.f32 1.442695, %v544_v52  ;;  %v2218_v58 = vadd.f32 %v535_v56, %v391_v44  ;;  %v782_v44 = vld [vmem:[%s2450_s5] sm:$0xff]  ;;  %v626_v52 = vpop.permute.xlu1 %625 }
 0x133   : > { %1880 = vpow2.f32 %v550_v54  ;;  %v547_v59 = vmin.f32 %v2216_v55, 20.0  ;;  %vm595_vm8 = vcmp.gt.f32.partialorder %v2216_v55, 20.0 }
 0x134   : > { %1882 = vpow2.f32 %v548_v57  ;;  %v546_v60 = vmin.f32 %v2218_v58, 20.0  ;;  %vm594_vm10 = vcmp.gt.f32.partialorder %v2218_v58, 20.0 }
 0x135   : > { %v554_v61 = vmul.f32 1.442695, %v547_v59 }
 0x136   : > { %v552_v62 = vmul.f32 1.442695, %v546_v60 }
 0x137   : > { %1884 = vpow2.f32 %v554_v61 }
 0x138   : > { %1886 = vpow2.f32 %v552_v62 }
 0x13d   : > { %v1881_v63 = vpop.eup %1880 }
 0x13e   : > { %v1883_v0 = vpop.eup %1882  ;;  %v565_v1 = vadd.f32 1.0, %v1881_v63  ;;  %v568_v6 = vmul.f32 -0.5, %v1881_v63  ;;  %v571_v10 = vand.u32 2147483647, %v1881_v63 }
 0x13f   : > { %v556_v2 = vadd.f32 1.0, %v1883_v0  ;;  %v559_v8 = vmul.f32 -0.5, %v1883_v0  ;;  %v562_v14 = vand.u32 2147483647, %v1883_v0 }
 0x140   : > { %1888 = vlog2.f32 %v565_v1  ;;  %v569_v9 = vadd.f32 1.0, %v568_v6  ;;  %vm572_vm3 = vcmp.lt.f32.partialorder %v571_v10, 0.0004427343 }
 0x141   : > { %v1885_v3 = vpop.eup %1884  ;;  %1890 = vlog2.f32 %v556_v2  ;;  %v560_v12 = vadd.f32 1.0, %v559_v8  ;;  %vm563_vm4 = vcmp.lt.f32.partialorder %v562_v14, 0.0004427343 }
 0x142   : > { %v1887_v4 = vpop.eup %1886  ;;  %v583_v5 = vadd.f32 1.0, %v1885_v3  ;;  %v586_v11 = vmul.f32 -0.5, %v1885_v3  ;;  %v570_v18 = vmul.f32 %v1881_v63, %v569_v9  ;;  %v589_v23 = vand.u32 2147483647, %v1885_v3 }
 0x143   : > { %v574_v7 = vadd.f32 1.0, %v1887_v4  ;;  %v577_v13 = vmul.f32 -0.5, %v1887_v4  ;;  %v561_v21 = vmul.f32 %v1883_v0, %v560_v12  ;;  %v580_v25 = vand.u32 2147483647, %v1887_v4 }
 0x144   : > { %1892 = vlog2.f32 %v583_v5  ;;  %v587_v19 = vadd.f32 1.0, %v586_v11  ;;  %vm590_vm7 = vcmp.lt.f32.partialorder %v589_v23, 0.0004427343 }
 0x145   : > { %1894 = vlog2.f32 %v574_v7  ;;  %v578_v22 = vadd.f32 1.0, %v577_v13  ;;  %vm581_vm9 = vcmp.lt.f32.partialorder %v580_v25, 0.0004427343 }
 0x146   : > { %v588_v32 = vmul.f32 %v1885_v3, %v587_v19 }
 0x147   : > { %v579_v35 = vmul.f32 %v1887_v4, %v578_v22 }
 0x14a   : > { %v1889_v15 = vpop.eup %1888 }
 0x14b   : > { %v1891_v16 = vpop.eup %1890  ;;  %v567_v17 = vmul.f32 0.6931472, %v1889_v15 }
 0x14c   : > { %v558_v20 = vmul.f32 0.6931472, %v1891_v16 }
 0x14d   : > { %v573_v24 = vsel %vm572_vm3, %v570_v18, %v567_v17 }
 0x14e   : > { %v1893_v26 = vpop.eup %1892  ;;  %v564_v27 = vsel %vm563_vm4, %v561_v21, %v558_v20  ;;  %v597_v28 = vsel %vm593_vm5, %v531_v47, %v573_v24 }
 0x14f   : > { %v1895_v29 = vpop.eup %1894  ;;  %v596_v30 = vsel %vm592_vm6, %v526_v49, %v564_v27  ;;  %v585_v31 = vmul.f32 0.6931472, %v1893_v26 }
 0x150   : > { %v1764_v33 = vpack.c.bf16 %v597_v28, %v596_v30  ;;  %v576_v34 = vmul.f32 0.6931472, %v1895_v29 }
 0x151   : > { %v591_v36 = vsel %vm590_vm7, %v588_v32, %v585_v31 }
 0x152   : > { %1765 = vmatprep.subr.bf16.mxu1 %v1764_v33  ;;  %v582_v37 = vsel %vm581_vm9, %v579_v35, %v576_v34  ;;  %v599_v38 = vsel %vm595_vm8, %v2216_v55, %v591_v36  ;;  %v621_v55 = vpop.permute.xlu0 %620 }
 0x153   : > { %1767 = vmatpush3.bf16.msra.mxu1 %v1764_v33  ;;  %v598_v39 = vsel %vm594_vm10, %v2218_v58, %v582_v37 }
 0x154   : > { %v1768_v40 = vpack.c.bf16 %v599_v38, %v598_v39 }
 0x156   : > { %1769 = vmatprep.subr.bf16.mxu1 %v1768_v40 }
 0x157   : > { %1771 = vmatpush3.bf16.msra.mxu1 %v1768_v40 }
 0x15a   : > { %1665 = vmatmul.mubr.msk.f32.vlgmr.msra.gmra.mrb[0].mxu1 %vm628_vm2, %v601_v41 }
 0x15b   : > { %1667 = vmatprep.mubr.msk.f32.mxu1 %vm628_vm2, %v602_v42 }
 0x15e   : > { %1668 = vmatmul.mubr.msk.f32.gmra.mrb[2].mxu1 %vm628_vm2, %v603_v43  ;;  %v783_v43 = vld [vmem:[%s2450_s5 + $0x8] sm:$0xff] }
 0x15f   : > { %1678 = vmatprep.mubr.msk.f32.mxu1 %vm628_vm2, %v782_v44  ;;  %v784_v44 = vld [vmem:[%s2450_s5 + $0x10] sm:$0xff] }
 0x22d   : > { %v1666_v47 = vpop.f32.mrb[0].mxu1 }
 0x22e   : > { %v713_v48 = vadd.f32 %v1666_v47, %v616_v45  ;;  %v707_v49 = vpop.f32.mrb[1].mxu1  ;;  %v785_v45 = vld [vmem:[%s2450_s5 + $0x18] sm:$0xff]  ;;  %v964_v47 = vld [vmem:[%s2452_s7 + $0x8] sm:$0xff] }
 0x22f   : > { %v708_v50 = vadd.f32 %v707_v49, %v611_v46  ;;  %v963_v46 = vld [vmem:[%s2452_s7] sm:$0xff]  ;;  %v798_v49 = vpop.permute.xlu1 %797 }
 0x230   : > { %v727_v51 = vmin.f32 %v713_v48, 20.0  ;;  %vm775_vm12 = vcmp.gt.f32.partialorder %v713_v48, 20.0 }
 0x231   : > { %v726_v53 = vmin.f32 %v708_v50, 20.0  ;;  %v1669_v54 = vpop.f32.mrb[2].mxu1  ;;  %vm774_vm14 = vcmp.gt.f32.partialorder %v708_v50, 20.0 }
 0x232   : > { %v732_v56 = vmul.f32 1.442695, %v727_v51  ;;  %v2242_v57 = vadd.f32 %v1669_v54, %v626_v52  ;;  %v717_v58 = vpop.f32.mrb[3].mxu1 }
 0x233   : > { %v730_v59 = vmul.f32 1.442695, %v726_v53  ;;  %v2244_v60 = vadd.f32 %v717_v58, %v621_v55 }
 0x234   : > { %1896 = vpow2.f32 %v732_v56  ;;  %v729_v61 = vmin.f32 %v2242_v57, 20.0  ;;  %vm777_vm1 = vcmp.gt.f32.partialorder %v2242_v57, 20.0  ;;  %v808_v56 = vpop.permute.xlu1 %807 }
 0x235   : > { %1898 = vpow2.f32 %v730_v59  ;;  %v728_v62 = vmin.f32 %v2244_v60, 20.0  ;;  %vm776_vm4 = vcmp.gt.f32.partialorder %v2244_v60, 20.0 }
 0x236   : > { %v736_v63 = vmul.f32 1.442695, %v729_v61 }
 0x237   : > { %v734_v0 = vmul.f32 1.442695, %v728_v62 }
 0x238   : > { %1900 = vpow2.f32 %v736_v63 }
 0x239   : > { %1902 = vpow2.f32 %v734_v0 }
 0x23e   : > { %v1897_v1 = vpop.eup %1896 }
 0x23f   : > { %v1899_v2 = vpop.eup %1898  ;;  %v747_v3 = vadd.f32 1.0, %v1897_v1  ;;  %v750_v8 = vmul.f32 -0.5, %v1897_v1  ;;  %v753_v12 = vand.u32 2147483647, %v1897_v1 }
 0x240   : > { %v738_v4 = vadd.f32 1.0, %v1899_v2  ;;  %v741_v10 = vmul.f32 -0.5, %v1899_v2  ;;  %v744_v16 = vand.u32 2147483647, %v1899_v2 }
 0x241   : > { %1904 = vlog2.f32 %v747_v3  ;;  %v751_v11 = vadd.f32 1.0, %v750_v8  ;;  %vm754_vm11 = vcmp.lt.f32.partialorder %v753_v12, 0.0004427343 }
 0x242   : > { %v1901_v5 = vpop.eup %1900  ;;  %1906 = vlog2.f32 %v738_v4  ;;  %v742_v14 = vadd.f32 1.0, %v741_v10  ;;  %vm745_vm13 = vcmp.lt.f32.partialorder %v744_v16, 0.0004427343 }
 0x243   : > { %v1903_v6 = vpop.eup %1902  ;;  %v765_v7 = vadd.f32 1.0, %v1901_v5  ;;  %v768_v13 = vmul.f32 -0.5, %v1901_v5  ;;  %v752_v20 = vmul.f32 %v1897_v1, %v751_v11  ;;  %v771_v25 = vand.u32 2147483647, %v1901_v5 }
 0x244   : > { %v756_v9 = vadd.f32 1.0, %v1903_v6  ;;  %v759_v15 = vmul.f32 -0.5, %v1903_v6  ;;  %v743_v23 = vmul.f32 %v1899_v2, %v742_v14  ;;  %v762_v27 = vand.u32 2147483647, %v1903_v6 }
 0x245   : > { %1908 = vlog2.f32 %v765_v7  ;;  %v769_v21 = vadd.f32 1.0, %v768_v13  ;;  %vm772_vm15 = vcmp.lt.f32.partialorder %v771_v25, 0.0004427343 }
 0x246   : > { %1910 = vlog2.f32 %v756_v9  ;;  %v760_v24 = vadd.f32 1.0, %v759_v15  ;;  %vm763_vm3 = vcmp.lt.f32.partialorder %v762_v27, 0.0004427343 }
 0x247   : > { %v770_v34 = vmul.f32 %v1901_v5, %v769_v21 }
 0x248   : > { %v761_v37 = vmul.f32 %v1903_v6, %v760_v24 }
 0x24b   : > { %v1905_v17 = vpop.eup %1904 }
 0x24c   : > { %v1907_v18 = vpop.eup %1906  ;;  %v749_v19 = vmul.f32 0.6931472, %v1905_v17 }
 0x24d   : > { %v740_v22 = vmul.f32 0.6931472, %v1907_v18 }
 0x24e   : > { %v755_v26 = vsel %vm754_vm11, %v752_v20, %v749_v19 }
 0x24f   : > { %v1909_v28 = vpop.eup %1908  ;;  %v746_v29 = vsel %vm745_vm13, %v743_v23, %v740_v22  ;;  %v779_v30 = vsel %vm775_vm12, %v713_v48, %v755_v26  ;;  %v1780_v48 = vpack.c.bf16 %v964_v47, %v963_v46 }
 0x250   : > { %v1911_v31 = vpop.eup %1910  ;;  %v778_v32 = vsel %vm774_vm14, %v708_v50, %v746_v29  ;;  %v767_v33 = vmul.f32 0.6931472, %v1909_v28  ;;  %v793_v50 = vpop.permute.xlu0 %792  ;;  %v965_v29 = vld [vmem:[%s2452_s7 + $0x10] sm:$0xff] }
 0x251   : > { %v1772_v35 = vpack.c.bf16 %v779_v30, %v778_v32  ;;  %v758_v36 = vmul.f32 0.6931472, %v1911_v31  ;;  %v966_v30 = vld [vmem:[%s2452_s7 + $0x18] sm:$0xff] }
 0x252   : > { %v773_v38 = vsel %vm772_vm15, %v770_v34, %v767_v33  ;;  %v1784_v34 = vpack.c.bf16 %v966_v30, %v965_v29 }
 0x253   : > { %1773 = vmatprep.subr.bf16.mxu1 %v1772_v35  ;;  %v764_v39 = vsel %vm763_vm3, %v761_v37, %v758_v36  ;;  %v781_v40 = vsel %vm777_vm1, %v2242_v57, %v773_v38 }
 0x254   : > { %1775 = vmatpush3.bf16.msra.mxu1 %v1772_v35  ;;  %v780_v41 = vsel %vm776_vm4, %v2244_v60, %v764_v39  ;;  %v803_v59 = vpop.permute.xlu0 %802 }
 0x255   : > { %v1776_v42 = vpack.c.bf16 %v781_v40, %v780_v41 }
 0x257   : > { %1777 = vmatprep.subr.bf16.mxu1 %v1776_v42 }
 0x258   : > { %1779 = vmatpush3.bf16.msra.mxu1 %v1776_v42 }
 0x259   : > { %1781 = vmatprep.subr.bf16.mxu1 %v1780_v48 }
 0x25b   : > { %1679 = vmatmul.mubr.msk.f32.vlgmr.msra.gmra.mrb[4].mxu1 %vm628_vm2, %v783_v43 }
 0x25c   : > { %1681 = vmatprep.mubr.msk.f32.mxu1 %vm628_vm2, %v784_v44  ;;  %1783 = vmatpush3.bf16.msra.mxu1 %v1780_v48 }
 0x25d   : > { %1785 = vmatprep.subr.bf16.mxu1 %v1784_v34 }
 0x25f   : > { %1682 = vmatmul.mubr.msk.f32.gmra.mrb[6].mxu1 %vm628_vm2, %v785_v45 }
 0x260   : > { %1787 = vmatpush3.bf16.msra.mxu1 %v1784_v34 }
 0x32e   : > { %v1680_v51 = vpop.f32.mrb[4].mxu1 }
 0x32f   : > { %v2270_v52 = vadd.f32 %v1680_v51, %v798_v49  ;;  %v888_v53 = vpop.f32.mrb[5].mxu1 }
 0x330   : > { %v889_v54 = vadd.f32 %v888_v53, %v793_v50 }
 0x331   : > { %v908_v55 = vmin.f32 %v2270_v52, 20.0  ;;  %vm956_vm8 = vcmp.gt.f32.partialorder %v2270_v52, 20.0 }
 0x332   : > { %v907_v57 = vmin.f32 %v889_v54, 20.0  ;;  %v1683_v58 = vpop.f32.mrb[6].mxu1  ;;  %vm955_vm6 = vcmp.gt.f32.partialorder %v889_v54, 20.0 }
 0x333   : > { %v913_v60 = vmul.f32 1.442695, %v908_v55  ;;  %v2273_v61 = vadd.f32 %v1683_v58, %v808_v56  ;;  %v898_v62 = vpop.f32.mrb[7].mxu1 }
 0x334   : > { %v911_v63 = vmul.f32 1.442695, %v907_v57  ;;  %v2275_v0 = vadd.f32 %v898_v62, %v803_v59 }
 0x335   : > { %1912 = vpow2.f32 %v913_v60  ;;  %v910_v1 = vmin.f32 %v2273_v61, 20.0  ;;  %vm958_vm12 = vcmp.gt.f32.partialorder %v2273_v61, 20.0 }
 0x336   : > { %1914 = vpow2.f32 %v911_v63  ;;  %v909_v2 = vmin.f32 %v2275_v0, 20.0  ;;  %vm957_vm10 = vcmp.gt.f32.partialorder %v2275_v0, 20.0 }
 0x337   : > { %v917_v3 = vmul.f32 1.442695, %v910_v1 }
 0x338   : > { %v915_v4 = vmul.f32 1.442695, %v909_v2 }
 0x339   : > { %1916 = vpow2.f32 %v917_v3 }
 0x33a   : > { %1918 = vpow2.f32 %v915_v4 }
 0x33f   : > { %v1913_v5 = vpop.eup %1912 }
 0x340   : > { %v1915_v6 = vpop.eup %1914  ;;  %v928_v7 = vadd.f32 1.0, %v1913_v5  ;;  %v931_v14 = vmul.f32 -0.5, %v1913_v5  ;;  %v934_v21 = vand.u32 2147483647, %v1913_v5 }
 0x341   : > { %v919_v8 = vadd.f32 1.0, %v1915_v6  ;;  %v922_v13 = vmul.f32 -0.5, %v1915_v6  ;;  %v925_v16 = vand.u32 2147483647, %v1915_v6 }
 0x342   : > { %1920 = vlog2.f32 %v928_v7  ;;  %v932_v18 = vadd.f32 1.0, %v931_v14  ;;  %vm935_vm7 = vcmp.lt.f32.partialorder %v934_v21, 0.0004427343 }
 0x343   : > { %v1917_v9 = vpop.eup %1916  ;;  %1922 = vlog2.f32 %v919_v8  ;;  %v923_v15 = vadd.f32 1.0, %v922_v13  ;;  %vm926_vm5 = vcmp.lt.f32.partialorder %v925_v16, 0.0004427343 }
 0x344   : > { %v1919_v10 = vpop.eup %1918  ;;  %v946_v12 = vadd.f32 1.0, %v1917_v9  ;;  %v933_v26 = vmul.f32 %v1913_v5, %v932_v18  ;;  %v949_v28 = vmul.f32 -0.5, %v1917_v9  ;;  %v952_v41 = vand.u32 2147483647, %v1917_v9 }
 0x345   : > { %v937_v11 = vadd.f32 1.0, %v1919_v10  ;;  %v940_v19 = vmul.f32 -0.5, %v1919_v10  ;;  %v924_v23 = vmul.f32 %v1915_v6, %v923_v15  ;;  %v943_v33 = vand.u32 2147483647, %v1919_v10 }
 0x346   : > { %v950_v39 = vadd.f32 1.0, %v949_v28  ;;  %vm953_vm11 = vcmp.lt.f32.partialorder %v952_v41, 0.0004427343 }
 0x347   : > { %1924 = vlog2.f32 %v937_v11  ;;  %v941_v27 = vadd.f32 1.0, %v940_v19  ;;  %vm944_vm9 = vcmp.lt.f32.partialorder %v943_v33, 0.0004427343 }
 0x348   : > { %1926 = vlog2.f32 %v946_v12  ;;  %v951_v44 = vmul.f32 %v1917_v9, %v950_v39 }
 0x349   : > { %v942_v38 = vmul.f32 %v1919_v10, %v941_v27 }
 0x34c   : > { %v1921_v17 = vpop.eup %1920 }
 0x34d   : > { %v1923_v20 = vpop.eup %1922  ;;  %v930_v24 = vmul.f32 0.6931472, %v1921_v17 }
 0x34e   : > { %v921_v22 = vmul.f32 0.6931472, %v1923_v20 }
 0x34f   : > { %v936_v35 = vsel %vm935_vm7, %v933_v26, %v930_v24 }
 0x350   : > { %v927_v25 = vsel %vm926_vm5, %v924_v23, %v921_v22  ;;  %v960_v40 = vsel %vm956_vm8, %v2270_v52, %v936_v35 }
 0x351   : > { %v1925_v31 = vpop.eup %1924  ;;  %v959_v32 = vsel %vm955_vm6, %v889_v54, %v927_v25 }
 0x352   : > { %974 = vxpose.xlu0.b32.start [1/4] (short) %v959_v32, 128  ;;  %v939_v36 = vmul.f32 0.6931472, %v1925_v31  ;;  %v1927_v37 = vpop.eup %1926 }
 0x353   : > { %v948_v43 = vmul.f32 0.6931472, %v1927_v37 }
 0x354   : > { %v945_v42 = vsel %vm944_vm9, %v942_v38, %v939_v36 }
 0x355   : > { %v961_v45 = vsel %vm957_vm10, %v2275_v0, %v945_v42  ;;  %v954_v46 = vsel %vm953_vm11, %v951_v44, %v948_v43  ;;  %v1525_v0 = vld [vmem:[%s2453_s8] ss:$0 sm:$0xff] }
 0x356   : > { %975 = vxpose.xlu0.b32.cont [2/4] (short) %v960_v40, 128  ;;  %v962_v47 = vsel %vm958_vm12, %v2273_v61, %v954_v46 }
 0x35a   : > { %976 = vxpose.xlu0.b32.cont [3/4] (short) %v961_v45, 128 }
 0x35e   : > { %977 = vxpose.xlu0.b32.end [4/4] (short) %v962_v47, 128 }
 0x3d2   : > { %v990_v48 = vpop.trf.xlu0 }
 0x3d3   : > { %1692 = vmatprep.mubr.msk.f32.mxu1 %vm628_vm2, %v990_v48 }
 0x3d6   : > { %v991_v49 = vpop.trf.xlu0 }
 0x3d7   : > { %1693 = vmatmul.mubr.msk.f32.vlgmr.msra.gmra.mrb[8].mxu1 %vm628_vm2, %v991_v49 }
 0x3da   : > { %v992_v50 = vpop.trf.xlu0 }
 0x3db   : > { %1695 = vmatprep.mubr.msk.f32.mxu1 %vm628_vm2, %v992_v50 }
 0x3de   : > { %v993_v51 = vpop.trf.xlu0 }
 0x3df   : > { %1696 = vmatmul.mubr.msk.f32.gmra.mrb[10].mxu1 %vm628_vm2, %v993_v51 }
 0x3e2   : > { %v994_v52 = vpop.trf.xlu0 }
 0x3e3   : > { %1698 = vmatprep.mubr.msk.f32.mxu1 %vm628_vm2, %v994_v52 }
 0x3e6   : > { %v995_v53 = vpop.trf.xlu0 }
 0x3e7   : > { %1699 = vmatmul.mubr.msk.f32.gmra.mrb[12].mxu1 %vm628_vm2, %v995_v53 }
 0x3ea   : > { %v996_v54 = vpop.trf.xlu0 }
 0x3eb   : > { %1701 = vmatprep.mubr.msk.f32.mxu1 %vm628_vm2, %v996_v54 }
 0x3ee   : > { %v997_v55 = vpop.trf.xlu0 }
 0x3ef   : > { %1702 = vmatmul.mubr.msk.f32.gmra.mrb[14].mxu1 %vm628_vm2, %v997_v55 }
 0x3f2   : > { %v998_v56 = vpop.trf.xlu0 }
 0x3f3   : > { %1704 = vmatprep.mubr.msk.f32.mxu1 %vm628_vm2, %v998_v56 }
 0x3f6   : > { %v999_v57 = vpop.trf.xlu0 }
 0x3f7   : > { %1705 = vmatmul.mubr.msk.f32.gmra.mrb[16].mxu1 %vm628_vm2, %v999_v57 }
 0x3fa   : > { %v1000_v58 = vpop.trf.xlu0 }
 0x3fb   : > { %1707 = vmatprep.mubr.msk.f32.mxu1 %vm628_vm2, %v1000_v58 }
 0x3fe   : > { %v1001_v59 = vpop.trf.xlu0 }
 0x3ff   : > { %1708 = vmatmul.mubr.msk.f32.gmra.mrb[18].mxu1 %vm628_vm2, %v1001_v59 }
 0x402   : > { %v1002_v60 = vpop.trf.xlu0 }
 0x403   : > { %1710 = vmatprep.mubr.msk.f32.mxu1 %vm628_vm2, %v1002_v60 }
 0x406   : > { %v1003_v61 = vpop.trf.xlu0 }
 0x407   : > { %1711 = vmatmul.mubr.msk.f32.gmra.mrb[20].mxu1 %vm628_vm2, %v1003_v61 }
 0x40a   : > { %v1004_v62 = vpop.trf.xlu0 }
 0x40b   : > { %1713 = vmatprep.mubr.msk.f32.mxu1 %vm628_vm2, %v1004_v62 }
 0x40e   : > { %v1005_v63 = vpop.trf.xlu0 }
 0x40f   : > { %1714 = vmatmul.mubr.msk.f32.gmra.mrb[22].mxu1 %vm628_vm2, %v1005_v63 }
 0x4aa   : > { %v1694_v1 = vpop.f32.mrb[8].mxu1 }
 0x4ab   : > { %v1126_v2 = vadd.f32 %v1694_v1, %v1525_v0  ;;  %v1120_v3 = vpop.f32.mrb[9].mxu1 }
 0x4ac   : > { %v1121_v4 = vadd.f32 %v1525_v0, %v1120_v3 }
 0x4ad   : > { %1200 = vst.msk [vmem:[%s2311_s28 + $0x8] sm:$0xff] %vm398_vm0, %v1126_v2 }
 0x4ae   : > { %1199 = vst.msk [vmem:[%s2311_s28] sm:$0xff] %vm398_vm0, %v1121_v4 }
 0x4b2   : > { %v1697_v5 = vpop.f32.mrb[10].mxu1 }
 0x4b3   : > { %v1136_v6 = vadd.f32 %v1697_v5, %v1525_v0  ;;  %v1130_v7 = vpop.f32.mrb[11].mxu1 }
 0x4b4   : > { %v1131_v8 = vadd.f32 %v1525_v0, %v1130_v7 }
 0x4b5   : > { %1202 = vst.msk [vmem:[%s2311_s28 + $0x18] sm:$0xff] %vm398_vm0, %v1136_v6 }
 0x4b6   : > { %1201 = vst.msk [vmem:[%s2311_s28 + $0x10] sm:$0xff] %vm398_vm0, %v1131_v8 }
 0x4ba   : > { %v1700_v9 = vpop.f32.mrb[12].mxu1 }
 0x4bb   : > { %v1146_v10 = vadd.f32 %v1700_v9, %v1525_v0  ;;  %v1140_v11 = vpop.f32.mrb[13].mxu1 }
 0x4bc   : > { %v1141_v12 = vadd.f32 %v1525_v0, %v1140_v11 }
 0x4bd   : > { %1204 = vst.msk [vmem:[%s2311_s28 + $0x28] sm:$0xff] %vm398_vm0, %v1146_v10 }
 0x4be   : > { %1203 = vst.msk [vmem:[%s2311_s28 + $0x20] sm:$0xff] %vm398_vm0, %v1141_v12 }
 0x4c2   : > { %v1703_v13 = vpop.f32.mrb[14].mxu1 }
 0x4c3   : > { %v1156_v14 = vadd.f32 %v1703_v13, %v1525_v0  ;;  %v1150_v15 = vpop.f32.mrb[15].mxu1 }
 0x4c4   : > { %v1151_v16 = vadd.f32 %v1525_v0, %v1150_v15 }
 0x4c5   : > { %1206 = vst.msk [vmem:[%s2311_s28 + $0x38] sm:$0xff] %vm398_vm0, %v1156_v14 }
 0x4c6   : > { %1205 = vst.msk [vmem:[%s2311_s28 + $0x30] sm:$0xff] %vm398_vm0, %v1151_v16 }
 0x4ca   : > { %v1706_v17 = vpop.f32.mrb[16].mxu1 }
 0x4cb   : > { %v1166_v18 = vadd.f32 %v1706_v17, %v1525_v0  ;;  %v1160_v19 = vpop.f32.mrb[17].mxu1 }
 0x4cc   : > { %v1161_v20 = vadd.f32 %v1525_v0, %v1160_v19 }
 0x4cd   : > { %1208 = vst.msk [vmem:[%s2311_s28 + $0x48] sm:$0xff] %vm398_vm0, %v1166_v18 }
 0x4ce   : > { %1207 = vst.msk [vmem:[%s2311_s28 + $0x40] sm:$0xff] %vm398_vm0, %v1161_v20 }
 0x4d2   : > { %v1709_v21 = vpop.f32.mrb[18].mxu1 }
 0x4d3   : > { %v1176_v22 = vadd.f32 %v1709_v21, %v1525_v0  ;;  %v1170_v23 = vpop.f32.mrb[19].mxu1 }
 0x4d4   : > { %v1171_v24 = vadd.f32 %v1525_v0, %v1170_v23 }
 0x4d5   : > { %1210 = vst.msk [vmem:[%s2311_s28 + $0x58] sm:$0xff] %vm398_vm0, %v1176_v22 }
 0x4d6   : > { %1209 = vst.msk [vmem:[%s2311_s28 + $0x50] sm:$0xff] %vm398_vm0, %v1171_v24 }
 0x4da   : > { %v1712_v25 = vpop.f32.mrb[20].mxu1 }
 0x4db   : > { %v1186_v26 = vadd.f32 %v1712_v25, %v1525_v0  ;;  %v1180_v27 = vpop.f32.mrb[21].mxu1 }
 0x4dc   : > { %v1181_v28 = vadd.f32 %v1525_v0, %v1180_v27 }
 0x4dd   : > { %1212 = vst.msk [vmem:[%s2311_s28 + $0x68] sm:$0xff] %vm398_vm0, %v1186_v26 }
 0x4de   : > { %1211 = vst.msk [vmem:[%s2311_s28 + $0x60] sm:$0xff] %vm398_vm0, %v1181_v28 }
 0x4e0   : > { %1221 = sbr.rel (!%p2092_p4) target bundleno = 1304 (0x518), region = 60 }
 0x4e2   : > { %v1715_v29 = vpop.f32.mrb[22].mxu1 }
 0x4e3   : > { %v1196_v30 = vadd.f32 %v1715_v29, %v1525_v0  ;;  %v1190_v31 = vpop.f32.mrb[23].mxu1 }
 0x4e4   : > { %v1191_v32 = vadd.f32 %v1525_v0, %v1190_v31 }
 0x4e5   : > { %1214 = vst.msk [vmem:[%s2311_s28 + $0x78] sm:$0xff] %vm398_vm0, %v1196_v30 }
 0x4e6   : > { %1213 = vst.msk [vmem:[%s2311_s28 + $0x70] sm:$0xff] %vm398_vm0, %v1191_v32 }
 0x4e7   : > { %s2465_s30 = smov (!%p1224_p8, %s1223_s30), 16 }
 0x4e8   : > { %s1544_s20 = sshll.u32 %s2465_s30, 7 }
 0x4e9   : > { %p1547_p9 = scmp.eq.s32.totalorder %s1544_s20, 0 }
 0x4ea   : > { %s2358_s21 = sshrl.u32 (!%p1547_p9), %s2465_s30, 4 }
 0x4eb   : > { %1232 = sbr.rel (%p1547_p9) target bundleno = 1304 (0x518), region = 64  ;;  %p1548_p10 = scmp.le.s32.totalorder (!%p1547_p9), %s2358_s21, 0 }
 0x4f2   : > { %1446 = sbr.rel (%p1548_p10) target bundleno = 1283 (0x503), region = 140  ;;  %s2458_s12 = smov (!%p1548_p10), %s2352_s15 }
 0x4f3   : > { %s2459_s17 = smov (!%p1548_p10), %s2311_s28  ;;  %s2367_s18 = smov (!%p1548_p10), 0  }
 0x4f4   : > { %s2369_s22 = smov (!%p1548_p10), 0  }
 0x4f9 LB: >> { %v1324_v33 = vld [vmem:[%s1990_s17] sm:$0xff]  ;;  %v1326_v34 = vld [vmem:[%s1990_s17 + $0x8] sm:$0xff]  ;;  %v1328_v35 = vld [vmem:[%s1990_s17 + $0x10] sm:$0xff]  ;;  %s1356_s23 = sadd.s32 1, %s1994_s18  ;;  %s1318_s22 = sadd.s32 1, %s1998_s22   ;;  %s1998_s22 = sphi %s2369_s22, %s1318_s22   ;;  %s1994_s18 = sphi %s2367_s18, %s2460_s18   ;;  %s1990_s17 = sphi %s2459_s17, %s1361_s17   ;;  %s1986_s12 = sphi %s2458_s12, %s1362_s12  }
 0x4fa   : >> { %1325 = vst [vmem:[%s1986_s12] sm:$0xff] %v1324_v33  ;;  %1327 = vst [vmem:[%s1986_s12 + $0x8] sm:$0xff] %v1326_v34  ;;  %v1330_v36 = vld [vmem:[%s1990_s17 + $0x18] sm:$0xff]  ;;  %v1332_v37 = vld [vmem:[%s1990_s17 + $0x20] sm:$0xff]  ;;  %p1357_p11 = scmp.ge.s32.totalorder %s1356_s23, %s2358_s21  ;;  %p1317_p12 = scmp.ge.s32.totalorder %s1318_s22, %s2358_s21 }
 0x4fb   : >> { %1329 = vst [vmem:[%s1986_s12 + $0x10] sm:$0xff] %v1328_v35  ;;  %v1334_v38 = vld [vmem:[%s1990_s17 + $0x28] sm:$0xff]  ;;  %1331 = vst [vmem:[%s1986_s12 + $0x18] sm:$0xff] %v1330_v36  ;;  %v1336_v39 = vld [vmem:[%s1990_s17 + $0x30] sm:$0xff] }
 0x4fc   : >> { %1333 = vst [vmem:[%s1986_s12 + $0x20] sm:$0xff] %v1332_v37  ;;  %1335 = vst [vmem:[%s1986_s12 + $0x28] sm:$0xff] %v1334_v38  ;;  %v1338_v40 = vld [vmem:[%s1990_s17 + $0x38] sm:$0xff]  ;;  %v1340_v41 = vld [vmem:[%s1990_s17 + $0x40] sm:$0xff]  ;;  %s2467_s23 = smov (%p1357_p11, %s1356_s23), 0  ;;  %1320 = sbr.rel (!%p1317_p12) target bundleno = 1273 (0x4f9), region = 146 }
 0x4fd   : >> { %1337 = vst [vmem:[%s1986_s12 + $0x30] sm:$0xff] %v1336_v39  ;;  %1339 = vst [vmem:[%s1986_s12 + $0x38] sm:$0xff] %v1338_v40  ;;  %v1342_v42 = vld [vmem:[%s1990_s17 + $0x48] sm:$0xff]  ;;  %v1344_v43 = vld [vmem:[%s1990_s17 + $0x50] sm:$0xff]  ;;  %s1549_s24 = sshll.u32 %s2467_s23, 7  ;;  %s2460_s18 = smov %s2467_s23 }
 0x4fe   : >> { %1341 = vst [vmem:[%s1986_s12 + $0x40] sm:$0xff] %v1340_v41  ;;  %v1346_v44 = vld [vmem:[%s1990_s17 + $0x58] sm:$0xff]  ;;  %1343 = vst [vmem:[%s1986_s12 + $0x48] sm:$0xff] %v1342_v42  ;;  %v1348_v45 = vld [vmem:[%s1990_s17 + $0x60] sm:$0xff] }
 0x4ff   : >> { %1345 = vst [vmem:[%s1986_s12 + $0x50] sm:$0xff] %v1344_v43  ;;  %1347 = vst [vmem:[%s1986_s12 + $0x58] sm:$0xff] %v1346_v44  ;;  %v1350_v46 = vld [vmem:[%s1990_s17 + $0x68] sm:$0xff]  ;;  %v1352_v47 = vld [vmem:[%s1990_s17 + $0x70] sm:$0xff] }
 0x500   : >> { %1349 = vst [vmem:[%s1986_s12 + $0x60] sm:$0xff] %v1348_v45  ;;  %1351 = vst [vmem:[%s1986_s12 + $0x68] sm:$0xff] %v1350_v46  ;;  %v1354_v48 = vld [vmem:[%s1990_s17 + $0x78] sm:$0xff]  ;;  %s1361_s17 = scalar_lea.vmem %s2311_s28, %s1549_s24 [#allocation2]  }
 0x501   : >> { %1353 = vst [vmem:[%s1986_s12 + $0x70] sm:$0xff] %v1352_v47  ;;  %1355 = vst [vmem:[%s1986_s12 + $0x78] sm:$0xff] %v1354_v48  ;;  %s1362_s12 = scalar_lea.vmem %s2352_s15, %s1549_s24  }
 0x503 PF: > { %s2427_s25 = sand.u32 15, %s2465_s30   ;;  %s1560_s26 = sshll.u32 %s2358_s21, 7 }
 0x504   : > { %s1367_s19 = scalar_lea.vmem %s2311_s28, %s1560_s26 [#allocation2]   ;;  %s1369_s27 = scalar_lea.vmem %s2352_s15, %s1560_s26  }
 0x505   : > { %p1554_p13 = scmp.le.s32.totalorder %s2427_s25, 0 }
 0x506   : > { %s2000_s29 = smov (!%p1554_p13), %s1369_s27   ;;  %s2004_s11 = smov (!%p1554_p13), %s1367_s19  }
 0x507   : > { %1460 = sbr.rel (%p1554_p13) target bundleno = 1304 (0x518), region = 151  ;;  %s2008_s14 = smov (!%p1554_p13), 0  }
 0x508   : > { %s2012_s20 = smov (!%p1554_p13), 0  }
 0x50e LB: >> { %v1379_v49 = vld [vmem:[%s2006_s11] sm:$0xff]  ;;  %s1381_s30 = sadd.s32 1, %s2010_s14  ;;  %s1373_s20 = sadd.s32 1, %s2014_s20   ;;  %s2014_s20 = sphi %s2012_s20, %s1373_s20   ;;  %s2010_s14 = sphi %s2008_s14, %s2009_s14   ;;  %s2006_s11 = sphi %s2004_s11, %s1386_s11   ;;  %s2002_s29 = sphi %s2000_s29, %s1387_s29  }
 0x50f   : >> { %1380 = vst [vmem:[%s2002_s29] sm:$0xff] %v1379_v49  ;;  %p1382_p0 = scmp.ge.s32.totalorder %s1381_s30, %s2427_s25  ;;  %p1372_p1 = scmp.ge.s32.totalorder %s1373_s20, %s2427_s25 }
 0x511   : >> { %s2469_s30 = smov (%p1382_p0, %s1381_s30), 0  ;;  %1375 = sbr.rel (!%p1372_p1) target bundleno = 1294 (0x50e), region = 157 }
 0x512   : >> { %s1555_s28 = sshll.u32 %s2469_s30, 3  ;;  %s2009_s14 = smov %s2469_s30  }
 0x513   : >> { %s1386_s11 = scalar_lea.vmem %s1367_s19, %s1555_s28 [#allocation2]   ;;  %s1387_s29 = scalar_lea.vmem %s1369_s27, %s1555_s28  }
 0x518 PF: > { %p16_p2 = scmp.ge.s32.totalorder %s2082_s13, 4   ;;  %s2461_s30 = smov %s1978_s10 }
 0x519   : > { %s2462_s10 = smov %s2090_s16  ;;  %s2463_s11 = smov %s2082_s13 }
 0x51a   :  { %18 = sbr.rel (!%p16_p2) target bundleno = 2 (0x2), region = 168 }

</bundles_post_ra>
